<compile_context>
chip_gen: v6e
topology: v6e:2x2x1
jax: 0.10.0
libtpu: 0.0.40
codegen_flags: <defaults>
</compile_context>

<pallas_src>
import functools

import jax
import jax.numpy as jnp
from jax.experimental import pallas as pl
from jax.experimental.pallas import tpu as pltpu


def _lstm_fc_sigmoid_kernel(x_ref, w_ih_ref, w_hh_ref, b_ref, w_fc_ref,
                            b_fc_ref, out_ref, xproj_ref, h_ref, c_ref,
                            hbuf_ref):
    """One (batch-block, time-chunk) grid step of the fused LSTM + fc + sigmoid.

    x_ref:     (TC, B, D)    VMEM   input block for this time chunk
    w_ih_ref:  (D, 4H)       VMEM   transposed weight_ih_l0
    w_hh_ref:  (H, 4H)       VMEM   transposed weight_hh_l0
    b_ref:     (1, 4H)       VMEM   bias_ih_l0 + bias_hh_l0
    w_fc_ref:  (1, H)        VMEM   fc.weight row
    b_fc_ref:  (1, 1)        SMEM   fc.bias scalar
    out_ref:   (1, 1, TC, B) VMEM   sigmoid(fc(h_t)) for this chunk
    xproj_ref: (TC, B, 4H)   VMEM scratch: input projection + gate bias
    h_ref:     (B, H)        VMEM scratch: hidden state (persists across chunks)
    c_ref:     (B, H)        VMEM scratch: cell state   (persists across chunks)
    hbuf_ref:  (TC, B, H)    VMEM scratch: per-step hidden states of this chunk
    """
    TC, B, _ = x_ref.shape
    H = w_hh_ref.shape[0]
    chunk = pl.program_id(1)

    # --- Prologue (off the recurrent critical path): one batched MXU matmul
    # for the whole chunk's input projection, gate bias folded in once.
    xproj_ref[...] = (
        jax.lax.dot_general(
            x_ref[...], w_ih_ref[...],
            dimension_numbers=(((2,), (0,)), ((), ())),
            preferred_element_type=jnp.float32,
        )
        + b_ref[...]                                     # (1, 4H) broadcast once
    )

    # Loop invariants, read once.
    w_hh = w_hh_ref[...]                                 # (H, 4H)

    def lstm_cell(gates, c):
        # 2 EUP pushes: one sigmoid over the full (B, 4H) slab, one tanh for g
        # (plus the tanh(c_new) inherent to the cell).
        sig = jax.nn.sigmoid(gates)                      # [i | f | . | o]
        g = jnp.tanh(gates[:, 2 * H:3 * H])
        c_new = sig[:, 1 * H:2 * H] * c + sig[:, 0 * H:1 * H] * g
        h_new = sig[:, 3 * H:4 * H] * jnp.tanh(c_new)
        return h_new, c_new

    def run_steps(t_start, h0, c0):
        # TODO(synk): for long recurrences keep W_hh resident in the MXU with
        # pltpu.matmul_push_rhs / matmul_acc_lhs / matmul_pop instead of
        # re-staging it inside jnp.dot every step; jnp.dot kept here for safety.
        def step(t, carry):
            h, c = carry
            # Single dependent MXU matmul per step on the recurrence.
            gates = xproj_ref[t] + jnp.dot(
                h, w_hh, preferred_element_type=jnp.float32)          # (B, 4H)
            h_new, c_new = lstm_cell(gates, c)
            hbuf_ref[t] = h_new
            return h_new, c_new

        # TC is static and small: full unroll gives the LLO scheduler
        # cross-step visibility.  Cap at unroll=2..4 for production-sized TC.
        h_fin, c_fin = jax.lax.fori_loop(t_start, TC, step, (h0, c0),
                                         unroll=True)
        h_ref[...] = h_fin
        c_ref[...] = c_fin

    @pl.when(chunk == 0)
    def _():
        # Peeled t == 0: h0 == c0 == 0, so gates_0 = xproj[0] and the
        # dependent recurrent matmul is skipped entirely for the first step.
        gates0 = xproj_ref[0]
        h1, c1 = lstm_cell(gates0, jnp.zeros((B, H), jnp.float32))
        hbuf_ref[0] = h1
        run_steps(1, h1, c1)

    @pl.when(chunk != 0)
    def _():
        run_steps(0, h_ref[...], c_ref[...])

    # --- Epilogue: fc(H -> 1) + sigmoid for the whole chunk as a VPU multiply
    # + cross-lane reduce (no N=1-column MXU matmul), written with ONE store.
    w_fc_row = w_fc_ref[...]                             # (1, H)
    b_fc = b_fc_ref[0, 0]                                # SMEM scalar
    logits = jnp.sum(hbuf_ref[...] * w_fc_row, axis=-1) + b_fc        # (TC, B)
    out_ref[...] = jax.nn.sigmoid(logits)[None, None, :, :]


@functools.partial(jax.jit, static_argnames=("time_chunk",))
def trajectory_classifier_forward(x, w_ih, w_hh, b_ih, b_hh, w_fc, b_fc,
                                  *, time_chunk=4):
    """x: (B, T, D) float32 -> (B, T, 1) float32 (matches PyTorch forward)."""
    B, T, D = x.shape
    H = w_hh.shape[1]
    TC = min(time_chunk, T)
    assert T % TC == 0, "sequence length must divide the time chunk"
    NC = T // TC
    NB = 1   # batch blocks: whole batch fits one block at these shapes

    x_tm = jnp.transpose(x, (1, 0, 2)).astype(jnp.float32)      # (T, B, D)
    w_ih_t = jnp.transpose(w_ih).astype(jnp.float32)             # (D, 4H)
    w_hh_t = jnp.transpose(w_hh).astype(jnp.float32)             # (H, 4H)
    b = (b_ih + b_hh).reshape(1, 4 * H).astype(jnp.float32)      # (1, 4H)
    w_fc_row = w_fc.reshape(1, H).astype(jnp.float32)            # (1, H)
    b_fc_s = b_fc.reshape(1, 1).astype(jnp.float32)              # (1, 1) SMEM

    out = pl.pallas_call(
        _lstm_fc_sigmoid_kernel,
        out_shape=jax.ShapeDtypeStruct((NB, NC, TC, B), jnp.float32),
        grid_spec=pltpu.PrefetchScalarGridSpec(
            num_scalar_prefetch=0,
            grid=(NB, NC),                       # (parallel batch, arbitrary time)
            in_specs=[
                pl.BlockSpec((TC, B, D), lambda nb, c: (c, nb, 0)),      # x chunk
                pl.BlockSpec((D, 4 * H), lambda nb, c: (0, 0)),          # W_ih^T
                pl.BlockSpec((H, 4 * H), lambda nb, c: (0, 0)),          # W_hh^T
                pl.BlockSpec((1, 4 * H), lambda nb, c: (0, 0)),          # gate bias
                pl.BlockSpec((1, H), lambda nb, c: (0, 0)),              # fc row
                pl.BlockSpec((1, 1), lambda nb, c: (0, 0),
                             memory_space=pltpu.MemorySpace.SMEM),       # fc bias
            ],
            out_specs=pl.BlockSpec((1, 1, TC, B), lambda nb, c: (nb, c, 0, 0)),
            scratch_shapes=[
                pltpu.VMEM((TC, B, 4 * H), jnp.float32),   # xproj (per chunk)
                pltpu.VMEM((B, H), jnp.float32),           # h state (persistent)
                pltpu.VMEM((B, H), jnp.float32),           # c state (persistent)
                pltpu.VMEM((TC, B, H), jnp.float32),       # per-chunk h stash
            ]),
        compiler_params=pltpu.CompilerParams(
            dimension_semantics=("parallel", "arbitrary")),
    )(x_tm, w_ih_t, w_hh_t, b, w_fc_row, b_fc_s)

    # (NB, NC, TC, B) -> (B, T, 1)
    return jnp.transpose(out, (0, 3, 1, 2)).reshape(B, T, 1)


def _reference_forward(x, w_ih, w_hh, b_ih, b_hh, w_fc, b_fc):
    """Pure-JAX reference matching torch.nn.LSTM + Linear + Sigmoid."""
    B, T, D = x.shape
    H = w_hh.shape[1]
    h = jnp.zeros((B, H), jnp.float32)
    c = jnp.zeros((B, H), jnp.float32)
    outs = []
    for t in range(T):
        gates = x[:, t, :] @ w_ih.T + h @ w_hh.T + b_ih + b_hh
        i_g = jax.nn.sigmoid(gates[:, 0 * H:1 * H])
        f_g = jax.nn.sigmoid(gates[:, 1 * H:2 * H])
        g_g = jnp.tanh(gates[:, 2 * H:3 * H])
        o_g = jax.nn.sigmoid(gates[:, 3 * H:4 * H])
        c = f_g * c + i_g * g_g
        h = o_g * jnp.tanh(c)
        outs.append(jax.nn.sigmoid(h @ w_fc.T + b_fc))
    return jnp.stack(outs, axis=1)                               # (B, T, 1)


if __name__ == "__main__":
    # Small shapes consistent with the module: batch=2, seq=8, input=4, hidden=32.
    B, T, D, H = 2, 8, 4, 32

    key = jax.random.PRNGKey(0)
    k = jax.random.split(key, 8)
    bound = 1.0 / jnp.sqrt(H)  # PyTorch default uniform init bound

    x = jax.random.normal(k[0], (B, T, D), jnp.float32)
    w_ih = jax.random.uniform(k[1], (4 * H, D), jnp.float32, -bound, bound)
    w_hh = jax.random.uniform(k[2], (4 * H, H), jnp.float32, -bound, bound)
    b_ih = jax.random.uniform(k[3], (4 * H,), jnp.float32, -bound, bound)
    b_hh = jax.random.uniform(k[4], (4 * H,), jnp.float32, -bound, bound)
    w_fc = jax.random.uniform(k[5], (1, H), jnp.float32, -bound, bound)
    b_fc = jax.random.uniform(k[6], (1,), jnp.float32, -bound, bound)

    out = trajectory_classifier_forward(x, w_ih, w_hh, b_ih, b_hh, w_fc, b_fc)
    out = jax.block_until_ready(out)
    assert out.shape == (B, T, 1), out.shape

    ref = _reference_forward(x, w_ih, w_hh, b_ih, b_hh, w_fc, b_fc)
    assert jnp.allclose(out, ref, rtol=1e-4, atol=1e-4), float(
        jnp.max(jnp.abs(out - ref)))

    print("KERNEL_OK")
</pallas_src>

<mosaic_0001>
module attributes {stable_mosaic.version = 11 : i64} {
  func.func @_lstm_fc_sigmoid_kernel(%arg0: i32, %arg1: i32, %arg2: memref<4x2x4xf32, #tpu.memory_space<vmem>>, %arg3: memref<4x128xf32, #tpu.memory_space<vmem>>, %arg4: memref<32x128xf32, #tpu.memory_space<vmem>>, %arg5: memref<1x128xf32, #tpu.memory_space<vmem>>, %arg6: memref<1x32xf32, #tpu.memory_space<vmem>>, %arg7: memref<1x1xf32, #tpu.memory_space<smem>>, %arg8: memref<1x1x4x2xf32, #tpu.memory_space<vmem>>, %arg9: memref<4x2x128xf32, #tpu.memory_space<vmem>>, %arg10: memref<2x32xf32, #tpu.memory_space<vmem>>, %arg11: memref<2x32xf32, #tpu.memory_space<vmem>>, %arg12: memref<4x2x32xf32, #tpu.memory_space<vmem>>) attributes {dimension_semantics = [#tpu.dimension_semantics<parallel>, #tpu.dimension_semantics<arbitrary>], iteration_bounds = array<i64: 1, 2>, scalar_prefetch = 0 : i64, scratch_operands = 4 : i64, tpu.core_type = #tpu.core_type<tc>, window_params = [{transform_indices = @transform_0, window_bounds = array<i64: 4, 2, 4>}, {pipeline_mode = #tpu.pipeline_mode<synchronous>, transform_indices = @transform_1, window_bounds = array<i64: 4, 128>}, {pipeline_mode = #tpu.pipeline_mode<synchronous>, transform_indices = @transform_2, window_bounds = array<i64: 32, 128>}, {pipeline_mode = #tpu.pipeline_mode<synchronous>, transform_indices = @transform_3, window_bounds = array<i64: 1, 128>}, {pipeline_mode = #tpu.pipeline_mode<synchronous>, transform_indices = @transform_4, window_bounds = array<i64: 1, 32>}, {transform_indices = @transform_5, window_bounds = array<i64: 1, 1>}, {transform_indices = @transform_6, window_bounds = array<i64: 1, 1, 4, 2>}]} {
    %c0 = arith.constant 0 : index
    %c0_0 = arith.constant 0 : index
    %c0_1 = arith.constant 0 : index
    %0 = vector.load %arg2[%c0, %c0_0, %c0_1] : memref<4x2x4xf32, #tpu.memory_space<vmem>>, vector<4x2x4xf32>
    %c0_2 = arith.constant 0 : index
    %c0_3 = arith.constant 0 : index
    %1 = vector.load %arg3[%c0_2, %c0_3] : memref<4x128xf32, #tpu.memory_space<vmem>>, vector<4x128xf32>
    %cst = arith.constant dense<0.000000e+00> : vector<4x2x128xf32>
    %2 = tpu.matmul %0, %1, %cst {dimension_numbers = #tpu.dot_dimension_numbers<[2], [0], [0, 1], [1], [0, 0, 0, 1, 1, 1], [], []>} : vector<4x2x4xf32>, vector<4x128xf32>, vector<4x2x128xf32> -> vector<4x2x128xf32>
    %c0_4 = arith.constant 0 : index
    %c0_5 = arith.constant 0 : index
    %3 = vector.load %arg5[%c0_4, %c0_5] : memref<1x128xf32, #tpu.memory_space<vmem>>, vector<1x128xf32>
    %4 = vector.shape_cast %3 : vector<1x128xf32> to vector<1x1x128xf32>
    %5 = vector.broadcast %4 : vector<1x1x128xf32> to vector<4x2x128xf32>
    %6 = arith.addf %2, %5 : vector<4x2x128xf32>
    %c0_6 = arith.constant 0 : index
    %c0_7 = arith.constant 0 : index
    %c0_8 = arith.constant 0 : index
    %7 = vector.load %arg9[%c0_6, %c0_7, %c0_8] : memref<4x2x128xf32, #tpu.memory_space<vmem>>, vector<4x2x128xf32>
    tpu.vector_store %arg9[%c0_6, %c0_7, %c0_8], %6 {strides = array<i32>} : memref<4x2x128xf32, #tpu.memory_space<vmem>>, vector<4x2x128xf32>,
    %c0_9 = arith.constant 0 : index
    %c0_10 = arith.constant 0 : index
    %8 = vector.load %arg4[%c0_9, %c0_10] : memref<32x128xf32, #tpu.memory_space<vmem>>, vector<32x128xf32>
    %c0_i32 = arith.constant 0 : i32
    %9 = arith.cmpi eq, %arg1, %c0_i32 : i32
    %10 = arith.extui %9 : i1 to i32
    %c0_i32_11 = arith.constant 0 : i32
    %11 = arith.cmpi ne, %10, %c0_i32_11 : i32
    scf.if %11 {
      %c0_27 = arith.constant 0 : index
      %c0_28 = arith.constant 0 : index
      %c0_29 = arith.constant 0 : index
      %31 = vector.load %arg9[%c0_27, %c0_28, %c0_29] : memref<4x2x128xf32, #tpu.memory_space<vmem>>, vector<1x2x128xf32>
      %32 = vector.shape_cast %31 : vector<1x2x128xf32> to vector<2x128xf32>
      %cst_30 = arith.constant 0.000000e+00 : f32
      %33 = vector.broadcast %cst_30 : f32 to vector<2x32xf32>
      %34 = arith.negf %32 : vector<2x128xf32>
      %35 = math.exp %34 : vector<2x128xf32>
      %cst_31 = arith.constant 1.000000e+00 : f32
      %36 = vector.broadcast %cst_31 : f32 to vector<2x128xf32>
      %37 = arith.addf %36, %35 : vector<2x128xf32>
      %38 = arith.divf %36, %37 : vector<2x128xf32>
      %39 = vector.extract_strided_slice %32 {offsets = [0, 64], sizes = [2, 32], strides = [1, 1]} : vector<2x128xf32> to vector<2x32xf32>
      %40 = math.tanh %39 : vector<2x32xf32>
      %41 = vector.extract_strided_slice %38 {offsets = [0, 32], sizes = [2, 32], strides = [1, 1]} : vector<2x128xf32> to vector<2x32xf32>
      %42 = arith.mulf %41, %33 : vector<2x32xf32>
      %43 = vector.extract_strided_slice %38 {offsets = [0, 0], sizes = [2, 32], strides = [1, 1]} : vector<2x128xf32> to vector<2x32xf32>
      %44 = arith.mulf %43, %40 : vector<2x32xf32>
      %45 = arith.addf %42, %44 : vector<2x32xf32>
      %46 = vector.extract_strided_slice %38 {offsets = [0, 96], sizes = [2, 32], strides = [1, 1]} : vector<2x128xf32> to vector<2x32xf32>
      %47 = math.tanh %45 : vector<2x32xf32>
      %48 = arith.mulf %46, %47 : vector<2x32xf32>
      %c0_32 = arith.constant 0 : index
      %c0_33 = arith.constant 0 : index
      %c0_34 = arith.constant 0 : index
      %49 = vector.load %arg12[%c0_32, %c0_33, %c0_34] : memref<4x2x32xf32, #tpu.memory_space<vmem>>, vector<1x2x32xf32>
      %50 = vector.shape_cast %49 : vector<1x2x32xf32> to vector<2x32xf32>
      %51 = vector.shape_cast %48 : vector<2x32xf32> to vector<1x2x32xf32>
      tpu.vector_store %arg12[%c0_32, %c0_33, %c0_34], %51 {strides = array<i32>} : memref<4x2x32xf32, #tpu.memory_space<vmem>>, vector<1x2x32xf32>,
      %c1_i32 = arith.constant 1 : i32
      %52 = arith.index_cast %c1_i32 : i32 to index
      %c0_35 = arith.constant 0 : index
      %c0_36 = arith.constant 0 : index
      %53 = vector.load %arg9[%52, %c0_35, %c0_36] : memref<4x2x128xf32, #tpu.memory_space<vmem>>, vector<1x2x128xf32>
      %54 = vector.shape_cast %53 : vector<1x2x128xf32> to vector<2x128xf32>
      %cst_37 = arith.constant dense<0.000000e+00> : vector<2x128xf32>
      %55 = tpu.matmul %48, %8, %cst_37 {dimension_numbers = #tpu.dot_dimension_numbers<[1], [0], [0], [1], [0, 0, 1, 1], [], []>} : vector<2x32xf32>, vector<32x128xf32>, vector<2x128xf32> -> vector<2x128xf32>
      %56 = arith.addf %54, %55 : vector<2x128xf32>
      %57 = arith.negf %56 : vector<2x128xf32>
      %58 = math.exp %57 : vector<2x128xf32>
      %cst_38 = arith.constant 1.000000e+00 : f32
      %59 = vector.broadcast %cst_38 : f32 to vector<2x128xf32>
      %60 = arith.addf %59, %58 : vector<2x128xf32>
      %61 = arith.divf %59, %60 : vector<2x128xf32>
      %62 = vector.extract_strided_slice %56 {offsets = [0, 64], sizes = [2, 32], strides = [1, 1]} : vector<2x128xf32> to vector<2x32xf32>
      %63 = math.tanh %62 : vector<2x32xf32>
      %64 = vector.extract_strided_slice %61 {offsets = [0, 32], sizes = [2, 32], strides = [1, 1]} : vector<2x128xf32> to vector<2x32xf32>
      %65 = arith.mulf %64, %45 : vector<2x32xf32>
      %66 = vector.extract_strided_slice %61 {offsets = [0, 0], sizes = [2, 32], strides = [1, 1]} : vector<2x128xf32> to vector<2x32xf32>
      %67 = arith.mulf %66, %63 : vector<2x32xf32>
      %68 = arith.addf %65, %67 : vector<2x32xf32>
      %69 = vector.extract_strided_slice %61 {offsets = [0, 96], sizes = [2, 32], strides = [1, 1]} : vector<2x128xf32> to vector<2x32xf32>
      %70 = math.tanh %68 : vector<2x32xf32>
      %71 = arith.mulf %69, %70 : vector<2x32xf32>
      %72 = arith.index_cast %c1_i32 : i32 to index
      %c0_39 = arith.constant 0 : index
      %c0_40 = arith.constant 0 : index
      %73 = vector.load %arg12[%72, %c0_39, %c0_40] : memref<4x2x32xf32, #tpu.memory_space<vmem>>, vector<1x2x32xf32>
      %74 = vector.shape_cast %73 : vector<1x2x32xf32> to vector<2x32xf32>
      %75 = vector.shape_cast %71 : vector<2x32xf32> to vector<1x2x32xf32>
      tpu.vector_store %arg12[%72, %c0_39, %c0_40], %75 {strides = array<i32>} : memref<4x2x32xf32, #tpu.memory_space<vmem>>, vector<1x2x32xf32>,
      %c2_i32 = arith.constant 2 : i32
      %76 = arith.index_cast %c2_i32 : i32 to index
      %c0_41 = arith.constant 0 : index
      %c0_42 = arith.constant 0 : index
      %77 = vector.load %arg9[%76, %c0_41, %c0_42] : memref<4x2x128xf32, #tpu.memory_space<vmem>>, vector<1x2x128xf32>
      %78 = vector.shape_cast %77 : vector<1x2x128xf32> to vector<2x128xf32>
      %cst_43 = arith.constant dense<0.000000e+00> : vector<2x128xf32>
      %79 = tpu.matmul %71, %8, %cst_43 {dimension_numbers = #tpu.dot_dimension_numbers<[1], [0], [0], [1], [0, 0, 1, 1], [], []>} : vector<2x32xf32>, vector<32x128xf32>, vector<2x128xf32> -> vector<2x128xf32>
      %80 = arith.addf %78, %79 : vector<2x128xf32>
      %81 = arith.negf %80 : vector<2x128xf32>
      %82 = math.exp %81 : vector<2x128xf32>
      %cst_44 = arith.constant 1.000000e+00 : f32
      %83 = vector.broadcast %cst_44 : f32 to vector<2x128xf32>
      %84 = arith.addf %83, %82 : vector<2x128xf32>
      %85 = arith.divf %83, %84 : vector<2x128xf32>
      %86 = vector.extract_strided_slice %80 {offsets = [0, 64], sizes = [2, 32], strides = [1, 1]} : vector<2x128xf32> to vector<2x32xf32>
      %87 = math.tanh %86 : vector<2x32xf32>
      %88 = vector.extract_strided_slice %85 {offsets = [0, 32], sizes = [2, 32], strides = [1, 1]} : vector<2x128xf32> to vector<2x32xf32>
      %89 = arith.mulf %88, %68 : vector<2x32xf32>
      %90 = vector.extract_strided_slice %85 {offsets = [0, 0], sizes = [2, 32], strides = [1, 1]} : vector<2x128xf32> to vector<2x32xf32>
      %91 = arith.mulf %90, %87 : vector<2x32xf32>
      %92 = arith.addf %89, %91 : vector<2x32xf32>
      %93 = vector.extract_strided_slice %85 {offsets = [0, 96], sizes = [2, 32], strides = [1, 1]} : vector<2x128xf32> to vector<2x32xf32>
      %94 = math.tanh %92 : vector<2x32xf32>
      %95 = arith.mulf %93, %94 : vector<2x32xf32>
      %96 = arith.index_cast %c2_i32 : i32 to index
      %c0_45 = arith.constant 0 : index
      %c0_46 = arith.constant 0 : index
      %97 = vector.load %arg12[%96, %c0_45, %c0_46] : memref<4x2x32xf32, #tpu.memory_space<vmem>>, vector<1x2x32xf32>
      %98 = vector.shape_cast %97 : vector<1x2x32xf32> to vector<2x32xf32>
      %99 = vector.shape_cast %95 : vector<2x32xf32> to vector<1x2x32xf32>
      tpu.vector_store %arg12[%96, %c0_45, %c0_46], %99 {strides = array<i32>} : memref<4x2x32xf32, #tpu.memory_space<vmem>>, vector<1x2x32xf32>,
      %c3_i32 = arith.constant 3 : i32
      %100 = arith.index_cast %c3_i32 : i32 to index
      %c0_47 = arith.constant 0 : index
      %c0_48 = arith.constant 0 : index
      %101 = vector.load %arg9[%100, %c0_47, %c0_48] : memref<4x2x128xf32, #tpu.memory_space<vmem>>, vector<1x2x128xf32>
      %102 = vector.shape_cast %101 : vector<1x2x128xf32> to vector<2x128xf32>
      %cst_49 = arith.constant dense<0.000000e+00> : vector<2x128xf32>
      %103 = tpu.matmul %95, %8, %cst_49 {dimension_numbers = #tpu.dot_dimension_numbers<[1], [0], [0], [1], [0, 0, 1, 1], [], []>} : vector<2x32xf32>, vector<32x128xf32>, vector<2x128xf32> -> vector<2x128xf32>
      %104 = arith.addf %102, %103 : vector<2x128xf32>
      %105 = arith.negf %104 : vector<2x128xf32>
      %106 = math.exp %105 : vector<2x128xf32>
      %cst_50 = arith.constant 1.000000e+00 : f32
      %107 = vector.broadcast %cst_50 : f32 to vector<2x128xf32>
      %108 = arith.addf %107, %106 : vector<2x128xf32>
      %109 = arith.divf %107, %108 : vector<2x128xf32>
      %110 = vector.extract_strided_slice %104 {offsets = [0, 64], sizes = [2, 32], strides = [1, 1]} : vector<2x128xf32> to vector<2x32xf32>
      %111 = math.tanh %110 : vector<2x32xf32>
      %112 = vector.extract_strided_slice %109 {offsets = [0, 32], sizes = [2, 32], strides = [1, 1]} : vector<2x128xf32> to vector<2x32xf32>
      %113 = arith.mulf %112, %92 : vector<2x32xf32>
      %114 = vector.extract_strided_slice %109 {offsets = [0, 0], sizes = [2, 32], strides = [1, 1]} : vector<2x128xf32> to vector<2x32xf32>
      %115 = arith.mulf %114, %111 : vector<2x32xf32>
      %116 = arith.addf %113, %115 : vector<2x32xf32>
      %117 = vector.extract_strided_slice %109 {offsets = [0, 96], sizes = [2, 32], strides = [1, 1]} : vector<2x128xf32> to vector<2x32xf32>
      %118 = math.tanh %116 : vector<2x32xf32>
      %119 = arith.mulf %117, %118 : vector<2x32xf32>
      %120 = arith.index_cast %c3_i32 : i32 to index
      %c0_51 = arith.constant 0 : index
      %c0_52 = arith.constant 0 : index
      %121 = vector.load %arg12[%120, %c0_51, %c0_52] : memref<4x2x32xf32, #tpu.memory_space<vmem>>, vector<1x2x32xf32>
      %122 = vector.shape_cast %121 : vector<1x2x32xf32> to vector<2x32xf32>
      %123 = vector.shape_cast %119 : vector<2x32xf32> to vector<1x2x32xf32>
      tpu.vector_store %arg12[%120, %c0_51, %c0_52], %123 {strides = array<i32>} : memref<4x2x32xf32, #tpu.memory_space<vmem>>, vector<1x2x32xf32>,
      %c3_i32_53 = arith.constant 3 : i32
      %c0_54 = arith.constant 0 : index
      %c0_55 = arith.constant 0 : index
      %124 = vector.load %arg10[%c0_54, %c0_55] : memref<2x32xf32, #tpu.memory_space<vmem>>, vector<2x32xf32>
      tpu.vector_store %arg10[%c0_54, %c0_55], %119 {strides = array<i32>} : memref<2x32xf32, #tpu.memory_space<vmem>>, vector<2x32xf32>,
      %c0_56 = arith.constant 0 : index
      %c0_57 = arith.constant 0 : index
      %125 = vector.load %arg11[%c0_56, %c0_57] : memref<2x32xf32, #tpu.memory_space<vmem>>, vector<2x32xf32>
      tpu.vector_store %arg11[%c0_56, %c0_57], %116 {strides = array<i32>} : memref<2x32xf32, #tpu.memory_space<vmem>>, vector<2x32xf32>,
    } else {
    }
    %c0_i32_12 = arith.constant 0 : i32
    %12 = arith.cmpi ne, %arg1, %c0_i32_12 : i32
    %13 = arith.extui %12 : i1 to i32
    %c0_i32_13 = arith.constant 0 : i32
    %14 = arith.cmpi ne, %13, %c0_i32_13 : i32
    scf.if %14 {
      %c0_27 = arith.constant 0 : index
      %c0_28 = arith.constant 0 : index
      %31 = vector.load %arg10[%c0_27, %c0_28] : memref<2x32xf32, #tpu.memory_space<vmem>>, vector<2x32xf32>
      %c0_29 = arith.constant 0 : index
      %c0_30 = arith.constant 0 : index
      %32 = vector.load %arg11[%c0_29, %c0_30] : memref<2x32xf32, #tpu.memory_space<vmem>>, vector<2x32xf32>
      %c0_i32_31 = arith.constant 0 : i32
      %33 = arith.index_cast %c0_i32_31 : i32 to index
      %c0_32 = arith.constant 0 : index
      %c0_33 = arith.constant 0 : index
      %34 = vector.load %arg9[%33, %c0_32, %c0_33] : memref<4x2x128xf32, #tpu.memory_space<vmem>>, vector<1x2x128xf32>
      %35 = vector.shape_cast %34 : vector<1x2x128xf32> to vector<2x128xf32>
      %cst_34 = arith.constant dense<0.000000e+00> : vector<2x128xf32>
      %36 = tpu.matmul %31, %8, %cst_34 {dimension_numbers = #tpu.dot_dimension_numbers<[1], [0], [0], [1], [0, 0, 1, 1], [], []>} : vector<2x32xf32>, vector<32x128xf32>, vector<2x128xf32> -> vector<2x128xf32>
      %37 = arith.addf %35, %36 : vector<2x128xf32>
      %38 = arith.negf %37 : vector<2x128xf32>
      %39 = math.exp %38 : vector<2x128xf32>
      %cst_35 = arith.constant 1.000000e+00 : f32
      %40 = vector.broadcast %cst_35 : f32 to vector<2x128xf32>
      %41 = arith.addf %40, %39 : vector<2x128xf32>
      %42 = arith.divf %40, %41 : vector<2x128xf32>
      %43 = vector.extract_strided_slice %37 {offsets = [0, 64], sizes = [2, 32], strides = [1, 1]} : vector<2x128xf32> to vector<2x32xf32>
      %44 = math.tanh %43 : vector<2x32xf32>
      %45 = vector.extract_strided_slice %42 {offsets = [0, 32], sizes = [2, 32], strides = [1, 1]} : vector<2x128xf32> to vector<2x32xf32>
      %46 = arith.mulf %45, %32 : vector<2x32xf32>
      %47 = vector.extract_strided_slice %42 {offsets = [0, 0], sizes = [2, 32], strides = [1, 1]} : vector<2x128xf32> to vector<2x32xf32>
      %48 = arith.mulf %47, %44 : vector<2x32xf32>
      %49 = arith.addf %46, %48 : vector<2x32xf32>
      %50 = vector.extract_strided_slice %42 {offsets = [0, 96], sizes = [2, 32], strides = [1, 1]} : vector<2x128xf32> to vector<2x32xf32>
      %51 = math.tanh %49 : vector<2x32xf32>
      %52 = arith.mulf %50, %51 : vector<2x32xf32>
      %53 = arith.index_cast %c0_i32_31 : i32 to index
      %c0_36 = arith.constant 0 : index
      %c0_37 = arith.constant 0 : index
      %54 = vector.load %arg12[%53, %c0_36, %c0_37] : memref<4x2x32xf32, #tpu.memory_space<vmem>>, vector<1x2x32xf32>
      %55 = vector.shape_cast %54 : vector<1x2x32xf32> to vector<2x32xf32>
      %56 = vector.shape_cast %52 : vector<2x32xf32> to vector<1x2x32xf32>
      tpu.vector_store %arg12[%53, %c0_36, %c0_37], %56 {strides = array<i32>} : memref<4x2x32xf32, #tpu.memory_space<vmem>>, vector<1x2x32xf32>,
      %c1_i32 = arith.constant 1 : i32
      %57 = arith.index_cast %c1_i32 : i32 to index
      %c0_38 = arith.constant 0 : index
      %c0_39 = arith.constant 0 : index
      %58 = vector.load %arg9[%57, %c0_38, %c0_39] : memref<4x2x128xf32, #tpu.memory_space<vmem>>, vector<1x2x128xf32>
      %59 = vector.shape_cast %58 : vector<1x2x128xf32> to vector<2x128xf32>
      %cst_40 = arith.constant dense<0.000000e+00> : vector<2x128xf32>
      %60 = tpu.matmul %52, %8, %cst_40 {dimension_numbers = #tpu.dot_dimension_numbers<[1], [0], [0], [1], [0, 0, 1, 1], [], []>} : vector<2x32xf32>, vector<32x128xf32>, vector<2x128xf32> -> vector<2x128xf32>
      %61 = arith.addf %59, %60 : vector<2x128xf32>
      %62 = arith.negf %61 : vector<2x128xf32>
      %63 = math.exp %62 : vector<2x128xf32>
      %cst_41 = arith.constant 1.000000e+00 : f32
      %64 = vector.broadcast %cst_41 : f32 to vector<2x128xf32>
      %65 = arith.addf %64, %63 : vector<2x128xf32>
      %66 = arith.divf %64, %65 : vector<2x128xf32>
      %67 = vector.extract_strided_slice %61 {offsets = [0, 64], sizes = [2, 32], strides = [1, 1]} : vector<2x128xf32> to vector<2x32xf32>
      %68 = math.tanh %67 : vector<2x32xf32>
      %69 = vector.extract_strided_slice %66 {offsets = [0, 32], sizes = [2, 32], strides = [1, 1]} : vector<2x128xf32> to vector<2x32xf32>
      %70 = arith.mulf %69, %49 : vector<2x32xf32>
      %71 = vector.extract_strided_slice %66 {offsets = [0, 0], sizes = [2, 32], strides = [1, 1]} : vector<2x128xf32> to vector<2x32xf32>
      %72 = arith.mulf %71, %68 : vector<2x32xf32>
      %73 = arith.addf %70, %72 : vector<2x32xf32>
      %74 = vector.extract_strided_slice %66 {offsets = [0, 96], sizes = [2, 32], strides = [1, 1]} : vector<2x128xf32> to vector<2x32xf32>
      %75 = math.tanh %73 : vector<2x32xf32>
      %76 = arith.mulf %74, %75 : vector<2x32xf32>
      %77 = arith.index_cast %c1_i32 : i32 to index
      %c0_42 = arith.constant 0 : index
      %c0_43 = arith.constant 0 : index
      %78 = vector.load %arg12[%77, %c0_42, %c0_43] : memref<4x2x32xf32, #tpu.memory_space<vmem>>, vector<1x2x32xf32>
      %79 = vector.shape_cast %78 : vector<1x2x32xf32> to vector<2x32xf32>
      %80 = vector.shape_cast %76 : vector<2x32xf32> to vector<1x2x32xf32>
      tpu.vector_store %arg12[%77, %c0_42, %c0_43], %80 {strides = array<i32>} : memref<4x2x32xf32, #tpu.memory_space<vmem>>, vector<1x2x32xf32>,
      %c2_i32 = arith.constant 2 : i32
      %81 = arith.index_cast %c2_i32 : i32 to index
      %c0_44 = arith.constant 0 : index
      %c0_45 = arith.constant 0 : index
      %82 = vector.load %arg9[%81, %c0_44, %c0_45] : memref<4x2x128xf32, #tpu.memory_space<vmem>>, vector<1x2x128xf32>
      %83 = vector.shape_cast %82 : vector<1x2x128xf32> to vector<2x128xf32>
      %cst_46 = arith.constant dense<0.000000e+00> : vector<2x128xf32>
      %84 = tpu.matmul %76, %8, %cst_46 {dimension_numbers = #tpu.dot_dimension_numbers<[1], [0], [0], [1], [0, 0, 1, 1], [], []>} : vector<2x32xf32>, vector<32x128xf32>, vector<2x128xf32> -> vector<2x128xf32>
      %85 = arith.addf %83, %84 : vector<2x128xf32>
      %86 = arith.negf %85 : vector<2x128xf32>
      %87 = math.exp %86 : vector<2x128xf32>
      %cst_47 = arith.constant 1.000000e+00 : f32
      %88 = vector.broadcast %cst_47 : f32 to vector<2x128xf32>
      %89 = arith.addf %88, %87 : vector<2x128xf32>
      %90 = arith.divf %88, %89 : vector<2x128xf32>
      %91 = vector.extract_strided_slice %85 {offsets = [0, 64], sizes = [2, 32], strides = [1, 1]} : vector<2x128xf32> to vector<2x32xf32>
      %92 = math.tanh %91 : vector<2x32xf32>
      %93 = vector.extract_strided_slice %90 {offsets = [0, 32], sizes = [2, 32], strides = [1, 1]} : vector<2x128xf32> to vector<2x32xf32>
      %94 = arith.mulf %93, %73 : vector<2x32xf32>
      %95 = vector.extract_strided_slice %90 {offsets = [0, 0], sizes = [2, 32], strides = [1, 1]} : vector<2x128xf32> to vector<2x32xf32>
      %96 = arith.mulf %95, %92 : vector<2x32xf32>
      %97 = arith.addf %94, %96 : vector<2x32xf32>
      %98 = vector.extract_strided_slice %90 {offsets = [0, 96], sizes = [2, 32], strides = [1, 1]} : vector<2x128xf32> to vector<2x32xf32>
      %99 = math.tanh %97 : vector<2x32xf32>
      %100 = arith.mulf %98, %99 : vector<2x32xf32>
      %101 = arith.index_cast %c2_i32 : i32 to index
      %c0_48 = arith.constant 0 : index
      %c0_49 = arith.constant 0 : index
      %102 = vector.load %arg12[%101, %c0_48, %c0_49] : memref<4x2x32xf32, #tpu.memory_space<vmem>>, vector<1x2x32xf32>
      %103 = vector.shape_cast %102 : vector<1x2x32xf32> to vector<2x32xf32>
      %104 = vector.shape_cast %100 : vector<2x32xf32> to vector<1x2x32xf32>
      tpu.vector_store %arg12[%101, %c0_48, %c0_49], %104 {strides = array<i32>} : memref<4x2x32xf32, #tpu.memory_space<vmem>>, vector<1x2x32xf32>,
      %c3_i32 = arith.constant 3 : i32
      %105 = arith.index_cast %c3_i32 : i32 to index
      %c0_50 = arith.constant 0 : index
      %c0_51 = arith.constant 0 : index
      %106 = vector.load %arg9[%105, %c0_50, %c0_51] : memref<4x2x128xf32, #tpu.memory_space<vmem>>, vector<1x2x128xf32>
      %107 = vector.shape_cast %106 : vector<1x2x128xf32> to vector<2x128xf32>
      %cst_52 = arith.constant dense<0.000000e+00> : vector<2x128xf32>
      %108 = tpu.matmul %100, %8, %cst_52 {dimension_numbers = #tpu.dot_dimension_numbers<[1], [0], [0], [1], [0, 0, 1, 1], [], []>} : vector<2x32xf32>, vector<32x128xf32>, vector<2x128xf32> -> vector<2x128xf32>
      %109 = arith.addf %107, %108 : vector<2x128xf32>
      %110 = arith.negf %109 : vector<2x128xf32>
      %111 = math.exp %110 : vector<2x128xf32>
      %cst_53 = arith.constant 1.000000e+00 : f32
      %112 = vector.broadcast %cst_53 : f32 to vector<2x128xf32>
      %113 = arith.addf %112, %111 : vector<2x128xf32>
      %114 = arith.divf %112, %113 : vector<2x128xf32>
      %115 = vector.extract_strided_slice %109 {offsets = [0, 64], sizes = [2, 32], strides = [1, 1]} : vector<2x128xf32> to vector<2x32xf32>
      %116 = math.tanh %115 : vector<2x32xf32>
      %117 = vector.extract_strided_slice %114 {offsets = [0, 32], sizes = [2, 32], strides = [1, 1]} : vector<2x128xf32> to vector<2x32xf32>
      %118 = arith.mulf %117, %97 : vector<2x32xf32>
      %119 = vector.extract_strided_slice %114 {offsets = [0, 0], sizes = [2, 32], strides = [1, 1]} : vector<2x128xf32> to vector<2x32xf32>
      %120 = arith.mulf %119, %116 : vector<2x32xf32>
      %121 = arith.addf %118, %120 : vector<2x32xf32>
      %122 = vector.extract_strided_slice %114 {offsets = [0, 96], sizes = [2, 32], strides = [1, 1]} : vector<2x128xf32> to vector<2x32xf32>
      %123 = math.tanh %121 : vector<2x32xf32>
      %124 = arith.mulf %122, %123 : vector<2x32xf32>
      %125 = arith.index_cast %c3_i32 : i32 to index
      %c0_54 = arith.constant 0 : index
      %c0_55 = arith.constant 0 : index
      %126 = vector.load %arg12[%125, %c0_54, %c0_55] : memref<4x2x32xf32, #tpu.memory_space<vmem>>, vector<1x2x32xf32>
      %127 = vector.shape_cast %126 : vector<1x2x32xf32> to vector<2x32xf32>
      %128 = vector.shape_cast %124 : vector<2x32xf32> to vector<1x2x32xf32>
      tpu.vector_store %arg12[%125, %c0_54, %c0_55], %128 {strides = array<i32>} : memref<4x2x32xf32, #tpu.memory_space<vmem>>, vector<1x2x32xf32>,
      %c4_i32 = arith.constant 4 : i32
      %c0_56 = arith.constant 0 : index
      %c0_57 = arith.constant 0 : index
      %129 = vector.load %arg10[%c0_56, %c0_57] : memref<2x32xf32, #tpu.memory_space<vmem>>, vector<2x32xf32>
      tpu.vector_store %arg10[%c0_56, %c0_57], %124 {strides = array<i32>} : memref<2x32xf32, #tpu.memory_space<vmem>>, vector<2x32xf32>,
      %c0_58 = arith.constant 0 : index
      %c0_59 = arith.constant 0 : index
      %130 = vector.load %arg11[%c0_58, %c0_59] : memref<2x32xf32, #tpu.memory_space<vmem>>, vector<2x32xf32>
      tpu.vector_store %arg11[%c0_58, %c0_59], %121 {strides = array<i32>} : memref<2x32xf32, #tpu.memory_space<vmem>>, vector<2x32xf32>,
    } else {
    }
    %c0_14 = arith.constant 0 : index
    %c0_15 = arith.constant 0 : index
    %15 = vector.load %arg6[%c0_14, %c0_15] : memref<1x32xf32, #tpu.memory_space<vmem>>, vector<1x32xf32>
    %c0_16 = arith.constant 0 : index
    %c0_17 = arith.constant 0 : index
    %16 = memref.load %arg7[%c0_16, %c0_17] : memref<1x1xf32, #tpu.memory_space<smem>>
    %c0_18 = arith.constant 0 : index
    %c0_19 = arith.constant 0 : index
    %c0_20 = arith.constant 0 : index
    %17 = vector.load %arg12[%c0_18, %c0_19, %c0_20] : memref<4x2x32xf32, #tpu.memory_space<vmem>>, vector<4x2x32xf32>
    %18 = vector.shape_cast %15 : vector<1x32xf32> to vector<1x1x32xf32>
    %19 = vector.broadcast %18 : vector<1x1x32xf32> to vector<4x2x32xf32>
    %20 = arith.mulf %17, %19 : vector<4x2x32xf32>
    %cst_21 = arith.constant dense<0.000000e+00> : vector<4x2xf32>
    %21 = vector.multi_reduction <add>, %20, %cst_21 [2] : vector<4x2x32xf32> to vector<4x2xf32>
    %22 = vector.broadcast %16 : f32 to vector<4x2xf32>
    %23 = arith.addf %21, %22 : vector<4x2xf32>
    %24 = arith.negf %23 : vector<4x2xf32>
    %25 = math.exp %24 : vector<4x2xf32>
    %cst_22 = arith.constant 1.000000e+00 : f32
    %26 = vector.broadcast %cst_22 : f32 to vector<4x2xf32>
    %27 = arith.addf %26, %25 : vector<4x2xf32>
    %28 = arith.divf %26, %27 : vector<4x2xf32>
    %29 = vector.shape_cast %28 : vector<4x2xf32> to vector<1x1x4x2xf32>
    %c0_23 = arith.constant 0 : index
    %c0_24 = arith.constant 0 : index
    %c0_25 = arith.constant 0 : index
    %c0_26 = arith.constant 0 : index
    %30 = vector.load %arg8[%c0_23, %c0_24, %c0_25, %c0_26] : memref<1x1x4x2xf32, #tpu.memory_space<vmem>>, vector<1x1x4x2xf32>
    tpu.vector_store %arg8[%c0_23, %c0_24, %c0_25, %c0_26], %29 {strides = array<i32>} : memref<1x1x4x2xf32, #tpu.memory_space<vmem>>, vector<1x1x4x2xf32>,
    return
  }
  func.func @transform_0(%arg0: i32, %arg1: i32) -> (i32, i32, i32) {
    %c0_i32 = arith.constant 0 : i32
    %c0_i32_0 = arith.constant 0 : i32
    return %arg1, %arg0, %c0_i32 : i32, i32, i32
  }
  func.func @transform_1(%arg0: i32, %arg1: i32) -> (i32, i32) {
    %c0_i32 = arith.constant 0 : i32
    %c0_i32_0 = arith.constant 0 : i32
    %c0_i32_1 = arith.constant 0 : i32
    return %c0_i32, %c0_i32_0 : i32, i32
  }
  func.func @transform_2(%arg0: i32, %arg1: i32) -> (i32, i32) {
    %c0_i32 = arith.constant 0 : i32
    %c0_i32_0 = arith.constant 0 : i32
    %c0_i32_1 = arith.constant 0 : i32
    return %c0_i32, %c0_i32_0 : i32, i32
  }
  func.func @transform_3(%arg0: i32, %arg1: i32) -> (i32, i32) {
    %c0_i32 = arith.constant 0 : i32
    %c0_i32_0 = arith.constant 0 : i32
    %c0_i32_1 = arith.constant 0 : i32
    return %c0_i32, %c0_i32_0 : i32, i32
  }
  func.func @transform_4(%arg0: i32, %arg1: i32) -> (i32, i32) {
    %c0_i32 = arith.constant 0 : i32
    %c0_i32_0 = arith.constant 0 : i32
    %c0_i32_1 = arith.constant 0 : i32
    return %c0_i32, %c0_i32_0 : i32, i32
  }
  func.func @transform_5(%arg0: i32, %arg1: i32) -> (i32, i32) {
    %c0_i32 = arith.constant 0 : i32
    %c0_i32_0 = arith.constant 0 : i32
    %c0_i32_1 = arith.constant 0 : i32
    return %c0_i32, %c0_i32_0 : i32, i32
  }
  func.func @transform_6(%arg0: i32, %arg1: i32) -> (i32, i32, i32, i32) {
    %c0_i32 = arith.constant 0 : i32
    %c0_i32_0 = arith.constant 0 : i32
    %c0_i32_1 = arith.constant 0 : i32
    return %arg0, %arg1, %c0_i32, %c0_i32_0 : i32, i32, i32, i32
  }
}

</mosaic_0001>

<bundles_post_ra>
// kernel: trajectory_classifier_forward.1
= control target key start
LH: loop header
LB: loop body
LE: loop exit
PB: predicated region body
PF: predicated region fallthrough
CT: control target
= control target key end

     0   :  { %s1746_s23 = smov 0   ;;  %s1748_s24 = smov 0   ;;  %s1931_s0 = inlined_call_operand.vmem [shape: f32[8,2,4], index: 0, kind: input, shape index: {}]   ;;  %s1932_s1 = inlined_call_operand.vmem [shape: f32[4,128], index: 1, kind: input, shape index: {}]   ;;  %s1933_s2 = inlined_call_operand.vmem [shape: f32[32,128], index: 2, kind: input, shape index: {}]   ;;  %s1934_s3 = inlined_call_operand.vmem [shape: f32[1,128], index: 3, kind: input, shape index: {}]   ;;  %s1935_s4 = inlined_call_operand.vmem [shape: f32[1,32], index: 4, kind: input, shape index: {}]   ;;  %s1936_s5 = inlined_call_operand.<no memory space> [shape: f32[1,1], index: 5, kind: input, shape index: {}]   ;;  %s1937_s6 = inlined_call_operand.vmem [shape: f32[1,2,4,2], index: 6, kind: output, shape index: {}]  }
   0x1   :  { %11 = sst [smem:[#allocation6]] %s1936_s5  ;;  %s1750_s25 = smov 0  }
   0x2 LB: > { %s26_s5 = sadd.s32 1, %s1689_s24  ;;  %p1402_p0 = scmp.ge.s32.totalorder %s1693_s25, 1  ;;  %s1693_s25 = sphi %s1750_s25, %s17_s25   ;;  %s1689_s24 = sphi %s1748_s24, %s1939_s24   ;;  %s1685_s23 = sphi %s1746_s23, %s1938_s23  }
   0x3   : > { %p27_p1 = scmp.ge.s32.totalorder %s26_s5, 2  ;;  %p233_p2 = scmp.lt.s32.totalorder %s1693_s25, 3 }
   0x5   : > { %s1941_s5 = smov (%p27_p1, %s26_s5), 0  ;;  %p234_p3 = pnand %p1402_p0, %p233_p2 }
   0x6   : > { %p280_p4 = scmp.lt.s32.totalorder (!%p234_p3), %s1685_s23, 1  ;;  %s1403_s28 = sshll.u32 (!%p234_p3), %s1685_s23, 2 }
   0x7   : > { %237 = sbr.rel (%p234_p3) target bundleno = 5748 (0x1674), region = 44  ;;  %p270_p5 = scmp.lt.s32.totalorder (!%p234_p3), %s1403_s28, 7 }
   0x8   : > { %p1411_p6 = scmp.ne.s32.totalorder (!%p234_p3), %s1685_s23, 0 }
   0xc   : > { %v290_v0 = vld [vmem:[%s1932_s1] sm:$0xf]  ;;  %vm331_vm0 = vcmask 1043456   ;;  %v1695_v1 = vmov 0.0   ;;  %vm1696_vm1 = vmmov 0   ;;  %v306_v2 = vlaneseq  ;;  %s281_s29 = scalar_select %p280_p4, %s1685_s23, 1 }
   0xd   : > { %1472 = vmatprep.subr.mxu0 %v1695_v1  ;;  %1474 = vmatprep.mubr.msk.f32.mxu0 %vm1696_vm1, %v1695_v1  ;;  %v1697_v3 = vmov 1983009808   ;;  %s1943_s28 = smov (!%p270_p5, %s1403_s28), 7  ;;  %vm328_vm2 = vcmask 31744   ;;  %v1787_v17 = vld [vmem:[%s1933_s2] sm:$0xff]  ;;  %v1792_v18 = vld [vmem:[%s1933_s2 + $0x8] sm:$0xff] }
   0xe   : > { %1473 = vmatpush3.msk.msra.mxu0 %vm331_vm0, %v290_v0  ;;  %v304_v4 = vunpack.c.l.s4 %v1697_v3  ;;  %s1405_s30 = sshll.u32 %s281_s29, 2  ;;  %v1778_v6 = vshrl.u32 %v306_v2, 7  ;;  %s1404_s10 = sshll.u32 %s1943_s28, 1  ;;  %v1797_v19 = vld [vmem:[%s1933_s2 + $0x10] sm:$0xff]  ;;  %v1802_v20 = vld [vmem:[%s1933_s2 + $0x18] sm:$0xff] }
   0xf   : > { %s1775_s9 = scalar_lea.vmem %s1937_s6, %s1405_s30  ;;  %s276_s13 = scalar_lea.vmem %s1931_s0, %s1404_s10  ;;  %v1406_v21 = vld [vmem:[%s1934_s3] ss:$0 sm:$0xff] }
  0x10   : > { %v305_v5 = vunpack.c.0.s8 %v304_v4  ;;  %v286_v8 = vld [vmem:[%s276_s13] sm:$0x3]  ;;  %v287_v9 = vld [vmem:[%s276_s13 + $0x2] sm:$0x3]  ;;  %v288_v10 = vld [vmem:[%s276_s13 + $0x4] sm:$0x3]  ;;  %v318_v22 = vcombine.low %v1406_v21, %v1406_v21 }
  0x11   : > { %v289_v11 = vld [vmem:[%s276_s13 + $0x6] sm:$0x3]  ;;  %v301_v12 = vcombine.low %v286_v8, %v287_v9  ;;  %s1698_s27 = smov (!%p1411_p6), 64   ;;  %s1699_s28 = smov (!%p1411_p6), 32  }
  0x12   : > { %v308_v7 = vsub.s32 %v305_v5, %v1778_v6  ;;  %v302_v13 = vcombine.low %v288_v10, %v289_v11  ;;  %s1702_s29 = smov (!%p1411_p6), 96  }
  0x14   : > { %v309_v14 = vrot.slane %v301_v12, %v308_v7  ;;  %v316_v15 = vrot.slane %v302_v13, %v308_v7  ;;  %v325_v23 = vrot.slane %v318_v22, %v308_v7 }
  0x16   : > { %v317_v16 = vcombine.low %v309_v14, %v316_v15  ;;  %v326_v24 = vcombine.low %v325_v23, %v325_v23 }
  0x18   : > { %1475 = vmatmul.mubr.msk.f32.vlgmr.msra.gmra.mxu0 %vm328_vm2, %v317_v16 }
  0xd8   : > { %v401_v25 = vpop.f32.mrf.mxu0 }
  0xd9   : > { %v402_v26 = vadd.f32 %v401_v25, %v326_v24 }
  0xda   : > { %v1476_v27 = vpop.f32.mrf.mxu0 }
  0xdb   : > { %v406_v28 = vcombine.high %v402_v26, %v402_v26  ;;  %v413_v29 = vrot.slane %v402_v26, %v308_v7  ;;  %1409 = vst.sshfl [vmem:[#allocation2] sm:$0x3 pattern:$0x76325410] %v402_v26 }
  0xdd   : > { %v420_v30 = vrot.slane %v406_v28, %v308_v7  ;;  %v421_v31 = vcombine.high %v413_v29, %v413_v29  ;;  %1410 = vst.sshfl [vmem:[#allocation2 + $0x4] sm:$0x3 pattern:$0x76325410] %v406_v28  ;;  %438 = sbr.rel (%p1411_p6) target bundleno = 2789 (0xae5), region = 48 }
  0xdf   : > { %v422_v32 = vcombine.high %v420_v30, %v420_v30  ;;  %428 = vst [vmem:[#allocation2 + $0x2] sm:$0x3] %v421_v31 }
  0xe1   : > { %430 = vst [vmem:[#allocation2 + $0x6] sm:$0x3] %v422_v32 }
  0xe2   : > { %v439_v33 = vld [vmem:[#allocation2] sm:$0x3]  ;;  %v1700_v44 = vmov 0.0   ;;  %vm1701_vm3 = vmmov 0   ;;  %vm468_vm4 = vcmask 254976   ;;  %vm472_vm5 = vcmask 261120  }
  0xe3   : > { %1591 = vtanh.f32 %v439_v33  ;;  %v1412_v35 = vmul.f32 -1.442695, %v439_v33  ;;  %1477 = vmatprep.subr.mxu0 %v1700_v44  ;;  %1485 = vmatprep.mubr.msk.f32.mxu0 %vm1701_vm3, %v1700_v44 }
  0xe4   : > { %1478 = vmatpush3.msra.mxu0 %v1802_v20  ;;  %1488 = vmatprep.subr.mxu1 %v1700_v44  ;;  %v577_v4 = vld [vmem:[#allocation2 + $0x4] sm:$0x3] }
  0xe5   : > { %1593 = vpow2.f32 %v1412_v35  ;;  %1479 = vmatprep.subr.mxu0 %v1700_v44  ;;  %1489 = vmatpush3.msra.mxu1 %v1802_v20 }
  0xe6   : > { %1480 = vmatpush3.msra.mxu0 %v1797_v19  ;;  %1490 = vmatprep.subr.mxu1 %v1700_v44  ;;  %v471_v49 = vld [vmem:[#allocation2 + $0x2] sm:$0x3] }
  0xe7   : > { %1481 = vmatprep.subr.mxu0 %v1700_v44  ;;  %1491 = vmatpush3.msra.mxu1 %v1797_v19 }
  0xe8   : > { %1482 = vmatpush3.msra.mxu0 %v1792_v18  ;;  %1492 = vmatprep.subr.mxu1 %v1700_v44  ;;  %v682_v27 = vld [vmem:[#allocation2 + $0x6] sm:$0x3] }
  0xe9   : > { %1483 = vmatprep.subr.mxu0 %v1700_v44  ;;  %1493 = vmatpush3.msra.mxu1 %v1792_v18 }
  0xea   : > { %1484 = vmatpush3.msra.mxu0 %v1787_v17  ;;  %1494 = vmatprep.subr.mxu1 %v1700_v44 }
  0xeb   : > { %1495 = vmatpush3.msra.mxu1 %v1787_v17  ;;  %1496 = vmatprep.mubr.msk.f32.mxu1 %vm1701_vm3, %v1700_v44 }
  0xec   : > { %1499 = vmatprep.subr.mxu0 %v1700_v44 }
  0xf0   : > { %v1592_v34 = vpop.eup %1591 }
  0xf1   : > { %449 = vrot.lane.b32.xlu0 %v1592_v34, %s1698_s27 }
  0xf2   : > { %v1594_v36 = vpop.eup %1593 }
  0xf3   : > { %v443_v37 = vadd.f32 1.0, %v1594_v36 }
  0xf5   : > { %1595 = vrcp.f32 %v443_v37 }
 0x102   : > { %v1596_v38 = vpop.eup %1595 }
 0x103   : > { %v447_v41 = vmul.f32 0.0, %v1596_v38 }
 0x163   : > { %v450_v39 = vpop.permute.xlu0 %449 }
 0x164   : > { %v452_v40 = vmul.f32 %v1596_v38, %v450_v39 }
 0x166   : > { %454 = vrot.lane.b32.xlu0 %v452_v40, %s1699_s28 }
 0x1d8   : > { %v455_v42 = vpop.permute.xlu0 %454 }
 0x1d9   : > { %v457_v43 = vadd.f32 %v455_v42, %v447_v41 }
 0x1db   : > { %1597 = vtanh.f32 %v457_v43 }
 0x1e8   : > { %v1598_v45 = vpop.eup %1597 }
 0x1e9   : > { %460 = vrot.lane.b32.xlu1 %v1598_v45, %s1698_s27 }
 0x25b   : > { %v461_v46 = vpop.permute.xlu1 %460 }
 0x25c   : > { %v463_v47 = vmul.f32 %v1596_v38, %v461_v46 }
 0x25e   : > { %465 = vrot.lane.b32.xlu1 %v463_v47, %s1699_s28 }
 0x2d0   : > { %v466_v48 = vpop.permute.xlu1 %465 }
 0x2d1   : > { %469 = vst.msk [vmem:[#allocation5] sm:$0x3] %vm468_vm4, %v466_v48  ;;  %1486 = vmatmul.mubr.msk.f32.vlgmr.msra.gmra.mxu0 %vm472_vm5, %v466_v48 }
 0x2d2   : > { %1500 = vmatpush3.msra.mxu0 %v1802_v20  ;;  %1507 = vmatprep.mubr.msk.f32.mxu0 %vm1701_vm3, %v1700_v44 }
 0x2d3   : > { %1501 = vmatprep.subr.mxu0 %v1700_v44 }
 0x2d4   : > { %1502 = vmatpush3.msra.mxu0 %v1797_v19 }
 0x2d5   : > { %1503 = vmatprep.subr.mxu0 %v1700_v44 }
 0x2d6   : > { %1504 = vmatpush3.msra.mxu0 %v1792_v18 }
 0x2d7   : > { %1505 = vmatprep.subr.mxu0 %v1700_v44 }
 0x2d8   : > { %1506 = vmatpush3.msra.mxu0 %v1787_v17 }
 0x391   : > { %v541_v50 = vpop.f32.mrf.mxu0 }
 0x392   : > { %v545_v51 = vadd.f32 %v541_v50, %v471_v49 }
 0x393   : > { %v1487_v52 = vpop.f32.mrf.mxu0 }
 0x394   : > { %1599 = vtanh.f32 %v545_v51  ;;  %v1414_v54 = vmul.f32 -1.442695, %v545_v51 }
 0x396   : > { %1601 = vpow2.f32 %v1414_v54 }
 0x3a1   : > { %v1600_v53 = vpop.eup %1599 }
 0x3a2   : > { %555 = vrot.lane.b32.xlu0 %v1600_v53, %s1698_s27 }
 0x3a3   : > { %v1602_v55 = vpop.eup %1601 }
 0x3a4   : > { %v549_v56 = vadd.f32 1.0, %v1602_v55 }
 0x3a6   : > { %1603 = vrcp.f32 %v549_v56 }
 0x3b3   : > { %v1604_v57 = vpop.eup %1603 }
 0x3b4   : > { %v553_v60 = vmul.f32 %v1604_v57, %v457_v43 }
 0x414   : > { %v556_v58 = vpop.permute.xlu0 %555 }
 0x415   : > { %v558_v59 = vmul.f32 %v1604_v57, %v556_v58 }
 0x417   : > { %560 = vrot.lane.b32.xlu1 %v558_v59, %s1699_s28 }
 0x489   : > { %v561_v61 = vpop.permute.xlu1 %560 }
 0x48a   : > { %v563_v62 = vadd.f32 %v561_v61, %v553_v60 }
 0x48c   : > { %1605 = vtanh.f32 %v563_v62 }
 0x499   : > { %v1606_v63 = vpop.eup %1605 }
 0x49a   : > { %566 = vrot.lane.b32.xlu0 %v1606_v63, %s1698_s27 }
 0x50c   : > { %v567_v0 = vpop.permute.xlu0 %566 }
 0x50d   : > { %v569_v1 = vmul.f32 %v1604_v57, %v567_v0 }
 0x50f   : > { %571 = vrot.lane.b32.xlu1 %v569_v1, %s1699_s28 }
 0x581   : > { %v572_v3 = vpop.permute.xlu1 %571 }
 0x582   : > { %575 = vst.msk [vmem:[#allocation5 + $0x2] sm:$0x3] %vm468_vm4, %v572_v3  ;;  %1497 = vmatmul.mubr.msk.f32.vlgmr.msra.gmra.mxu1 %vm472_vm5, %v572_v3 }
 0x642   : > { %v646_v5 = vpop.f32.mrf.mxu1 }
 0x643   : > { %v650_v7 = vadd.f32 %v646_v5, %v577_v4 }
 0x644   : > { %v1498_v8 = vpop.f32.mrf.mxu1 }
 0x645   : > { %1607 = vtanh.f32 %v650_v7  ;;  %v1416_v10 = vmul.f32 -1.442695, %v650_v7 }
 0x647   : > { %1609 = vpow2.f32 %v1416_v10 }
 0x652   : > { %v1608_v9 = vpop.eup %1607 }
 0x653   : > { %660 = vrot.lane.b32.xlu0 %v1608_v9, %s1698_s27 }
 0x654   : > { %v1610_v11 = vpop.eup %1609 }
 0x655   : > { %v654_v12 = vadd.f32 1.0, %v1610_v11 }
 0x657   : > { %1611 = vrcp.f32 %v654_v12 }
 0x664   : > { %v1612_v13 = vpop.eup %1611 }
 0x665   : > { %v658_v16 = vmul.f32 %v1612_v13, %v563_v62 }
 0x6c5   : > { %v661_v14 = vpop.permute.xlu0 %660 }
 0x6c6   : > { %v663_v15 = vmul.f32 %v1612_v13, %v661_v14 }
 0x6c8   : > { %665 = vrot.lane.b32.xlu1 %v663_v15, %s1699_s28 }
 0x73a   : > { %v666_v21 = vpop.permute.xlu1 %665 }
 0x73b   : > { %v668_v22 = vadd.f32 %v666_v21, %v658_v16 }
 0x73d   : > { %1613 = vtanh.f32 %v668_v22 }
 0x74a   : > { %v1614_v23 = vpop.eup %1613 }
 0x74b   : > { %671 = vrot.lane.b32.xlu0 %v1614_v23, %s1698_s27 }
 0x7bd   : > { %v672_v24 = vpop.permute.xlu0 %671 }
 0x7be   : > { %v674_v25 = vmul.f32 %v1612_v13, %v672_v24 }
 0x7c0   : > { %676 = vrot.lane.b32.xlu1 %v674_v25, %s1699_s28 }
 0x832   : > { %v677_v26 = vpop.permute.xlu1 %676 }
 0x833   : > { %680 = vst.msk [vmem:[#allocation5 + $0x4] sm:$0x3] %vm468_vm4, %v677_v26  ;;  %1508 = vmatmul.mubr.msk.f32.vlgmr.msra.gmra.mxu0 %vm472_vm5, %v677_v26 }
 0x8f3   : > { %v751_v28 = vpop.f32.mrf.mxu0 }
 0x8f4   : > { %v755_v29 = vadd.f32 %v751_v28, %v682_v27 }
 0x8f5   : > { %v1509_v30 = vpop.f32.mrf.mxu0 }
 0x8f6   : > { %1615 = vtanh.f32 %v755_v29  ;;  %v1418_v32 = vmul.f32 -1.442695, %v755_v29 }
 0x8f8   : > { %1617 = vpow2.f32 %v1418_v32 }
 0x903   : > { %v1616_v31 = vpop.eup %1615 }
 0x904   : > { %765 = vrot.lane.b32.xlu0 %v1616_v31, %s1698_s27 }
 0x905   : > { %v1618_v33 = vpop.eup %1617 }
 0x906   : > { %v759_v34 = vadd.f32 1.0, %v1618_v33 }
 0x908   : > { %1619 = vrcp.f32 %v759_v34 }
 0x915   : > { %v1620_v35 = vpop.eup %1619 }
 0x916   : > { %v763_v38 = vmul.f32 %v1620_v35, %v668_v22 }
 0x976   : > { %v766_v36 = vpop.permute.xlu0 %765 }
 0x977   : > { %v768_v37 = vmul.f32 %v1620_v35, %v766_v36 }
 0x979   : > { %770 = vrot.lane.b32.xlu1 %v768_v37, %s1699_s28 }
 0x9eb   : > { %v771_v39 = vpop.permute.xlu1 %770 }
 0x9ec   : > { %v773_v40 = vadd.f32 %v771_v39, %v763_v38 }
 0x9ee   : > { %1621 = vtanh.f32 %v773_v40 }
 0x9fb   : > { %v1622_v41 = vpop.eup %1621 }
 0x9fc   : > { %776 = vrot.lane.b32.xlu0 %v1622_v41, %s1698_s27 }
 0xa00   : > { %788 = vrot.lane.b32.xlu0 %v773_v40, %s1702_s29 }
 0xa6e   : > { %v777_v42 = vpop.permute.xlu0 %776 }
 0xa6f   : > { %v779_v43 = vmul.f32 %v1620_v35, %v777_v42 }
 0xa71   : > { %781 = vrot.lane.b32.xlu1 %v779_v43, %s1699_s28 }
 0xa72   : > { %v789_v44 = vpop.permute.xlu0 %788 }
 0xa73   : > { %791 = vst.msk [vmem:[#allocation4] sm:$0x3] %vm468_vm4, %v789_v44 }
 0xae3   : > { %v782_v45 = vpop.permute.xlu1 %781 }
 0xae4   : > { %785 = vst.msk [vmem:[#allocation5 + $0x6] sm:$0x3] %vm468_vm4, %v782_v45  ;;  %786 = vst.msk [vmem:[#allocation3] sm:$0x3] %vm468_vm4, %v782_v45 }
 0xae5 PF: > { %p1419_p7 = scmp.eq.s32.totalorder %s1685_s23, 0 }
 0xae6   : > { %s1705_s23 = smov (!%p1419_p7), 64   ;;  %s1706_s30 = smov (!%p1419_p7), 32  }
 0xae7   : > { %795 = sbr.rel (%p1419_p7) target bundleno = 5562 (0x15ba), region = 52  ;;  %s1707_s7 = smov (!%p1419_p7), 96  }
 0xaec   : > { %v1703_v46 = vmov 0.0   ;;  %vm1704_vm6 = vmmov 0   ;;  %v796_v47 = vld [vmem:[#allocation3] sm:$0x3]  ;;  %vm799_vm7 = vcmask 261120   ;;  %vm906_vm8 = vcmask 254976  }
 0xaed   : > { %1510 = vmatprep.subr.mxu0 %v1703_v46  ;;  %1518 = vmatprep.mubr.msk.f32.mxu0 %vm1704_vm6, %v1703_v46  ;;  %v798_v48 = vld [vmem:[#allocation2] sm:$0x3]  ;;  %v797_v53 = vld [vmem:[#allocation4] sm:$0x3]  ;;  %v909_v5 = vld [vmem:[#allocation2 + $0x2] sm:$0x3] }
 0xaee   : > { %1511 = vmatpush3.msra.mxu0 %v1802_v20  ;;  %1521 = vmatprep.subr.mxu1 %v1703_v46  ;;  %v1014_v24 = vld [vmem:[#allocation2 + $0x4] sm:$0x3]  ;;  %v1119_v42 = vld [vmem:[#allocation2 + $0x6] sm:$0x3] }
 0xaef   : > { %1512 = vmatprep.subr.mxu0 %v1703_v46  ;;  %1522 = vmatpush3.msra.mxu1 %v1802_v20 }
 0xaf0   : > { %1513 = vmatpush3.msra.mxu0 %v1797_v19  ;;  %1523 = vmatprep.subr.mxu1 %v1703_v46 }
 0xaf1   : > { %1514 = vmatprep.subr.mxu0 %v1703_v46  ;;  %1524 = vmatpush3.msra.mxu1 %v1797_v19 }
 0xaf2   : > { %1515 = vmatpush3.msra.mxu0 %v1792_v18  ;;  %1525 = vmatprep.subr.mxu1 %v1703_v46 }
 0xaf3   : > { %1516 = vmatprep.subr.mxu0 %v1703_v46  ;;  %1526 = vmatpush3.msra.mxu1 %v1792_v18 }
 0xaf4   : > { %1517 = vmatpush3.msra.mxu0 %v1787_v17  ;;  %1527 = vmatprep.subr.mxu1 %v1703_v46 }
 0xaf5   : > { %1519 = vmatmul.mubr.msk.f32.vlgmr.msra.gmra.mxu0 %vm799_vm7, %v796_v47  ;;  %1528 = vmatpush3.msra.mxu1 %v1787_v17 }
 0xaf6   : > { %1529 = vmatprep.mubr.msk.f32.mxu1 %vm1704_vm6, %v1703_v46  ;;  %1532 = vmatprep.subr.mxu0 %v1703_v46 }
 0xaf7   : > { %1533 = vmatpush3.msra.mxu0 %v1802_v20  ;;  %1540 = vmatprep.mubr.msk.f32.mxu0 %vm1704_vm6, %v1703_v46 }
 0xaf8   : > { %1534 = vmatprep.subr.mxu0 %v1703_v46  ;;  %1543 = vmatprep.subr.mxu1 %v1703_v46 }
 0xaf9   : > { %1535 = vmatpush3.msra.mxu0 %v1797_v19 }
 0xafa   : > { %1536 = vmatprep.subr.mxu0 %v1703_v46 }
 0xafb   : > { %1537 = vmatpush3.msra.mxu0 %v1792_v18 }
 0xafc   : > { %1538 = vmatprep.subr.mxu0 %v1703_v46 }
 0xafd   : > { %1539 = vmatpush3.msra.mxu0 %v1787_v17 }
 0xbb5   : > { %v869_v49 = vpop.f32.mrf.mxu0 }
 0xbb6   : > { %v873_v50 = vadd.f32 %v869_v49, %v798_v48 }
 0xbb7   : > { %v1520_v51 = vpop.f32.mrf.mxu0 }
 0xbb8   : > { %1623 = vtanh.f32 %v873_v50  ;;  %v1421_v54 = vmul.f32 -1.442695, %v873_v50 }
 0xbba   : > { %1625 = vpow2.f32 %v1421_v54 }
 0xbc5   : > { %v1624_v52 = vpop.eup %1623 }
 0xbc6   : > { %887 = vrot.lane.b32.xlu0 %v1624_v52, %s1705_s23 }
 0xbc7   : > { %v1626_v55 = vpop.eup %1625 }
 0xbc8   : > { %v877_v56 = vadd.f32 1.0, %v1626_v55 }
 0xbca   : > { %882 = vrot.lane.b32.xlu0 %v797_v53, %s1706_s30  ;;  %1627 = vrcp.f32 %v877_v56 }
 0xbd7   : > { %v1628_v57 = vpop.eup %1627 }
 0xc38   : > { %v888_v58 = vpop.permute.xlu0 %887 }
 0xc39   : > { %v890_v59 = vmul.f32 %v1628_v57, %v888_v58 }
 0xc3b   : > { %892 = vrot.lane.b32.xlu1 %v890_v59, %s1706_s30 }
 0xc3c   : > { %v883_v60 = vpop.permute.xlu0 %882 }
 0xc3d   : > { %v885_v61 = vmul.f32 %v1628_v57, %v883_v60 }
 0xcad   : > { %v893_v62 = vpop.permute.xlu1 %892 }
 0xcae   : > { %v895_v63 = vadd.f32 %v893_v62, %v885_v61 }
 0xcb0   : > { %1629 = vtanh.f32 %v895_v63 }
 0xcbd   : > { %v1630_v0 = vpop.eup %1629 }
 0xcbe   : > { %898 = vrot.lane.b32.xlu1 %v1630_v0, %s1705_s23 }
 0xd30   : > { %v899_v1 = vpop.permute.xlu1 %898 }
 0xd31   : > { %v901_v3 = vmul.f32 %v1628_v57, %v899_v1 }
 0xd33   : > { %903 = vrot.lane.b32.xlu0 %v901_v3, %s1706_s30 }
 0xda5   : > { %v904_v4 = vpop.permute.xlu0 %903 }
 0xda6   : > { %907 = vst.msk [vmem:[#allocation5] sm:$0x3] %vm906_vm8, %v904_v4  ;;  %1530 = vmatmul.mubr.msk.f32.vlgmr.msra.gmra.mxu1 %vm799_vm7, %v904_v4 }
 0xda7   : > { %1544 = vmatpush3.msra.mxu1 %v1802_v20  ;;  %1551 = vmatprep.mubr.msk.f32.mxu1 %vm1704_vm6, %v1703_v46 }
 0xda8   : > { %1545 = vmatprep.subr.mxu1 %v1703_v46 }
 0xda9   : > { %1546 = vmatpush3.msra.mxu1 %v1797_v19 }
 0xdaa   : > { %1547 = vmatprep.subr.mxu1 %v1703_v46 }
 0xdab   : > { %1548 = vmatpush3.msra.mxu1 %v1792_v18 }
 0xdac   : > { %1549 = vmatprep.subr.mxu1 %v1703_v46 }
 0xdad   : > { %1550 = vmatpush3.msra.mxu1 %v1787_v17 }
 0xe66   : > { %v978_v7 = vpop.f32.mrf.mxu1 }
 0xe67   : > { %v982_v8 = vadd.f32 %v978_v7, %v909_v5 }
 0xe68   : > { %v1531_v9 = vpop.f32.mrf.mxu1 }
 0xe69   : > { %1631 = vtanh.f32 %v982_v8  ;;  %v1423_v10 = vmul.f32 -1.442695, %v982_v8 }
 0xe6b   : > { %1633 = vpow2.f32 %v1423_v10 }
 0xe76   : > { %v1632_v20 = vpop.eup %1631 }
 0xe77   : > { %992 = vrot.lane.b32.xlu1 %v1632_v20, %s1705_s23 }
 0xe78   : > { %v1634_v11 = vpop.eup %1633 }
 0xe79   : > { %v986_v19 = vadd.f32 1.0, %v1634_v11 }
 0xe7b   : > { %1635 = vrcp.f32 %v986_v19 }
 0xe88   : > { %v1636_v12 = vpop.eup %1635 }
 0xe89   : > { %v990_v14 = vmul.f32 %v1636_v12, %v895_v63 }
 0xee9   : > { %v993_v13 = vpop.permute.xlu1 %992 }
 0xeea   : > { %v995_v18 = vmul.f32 %v1636_v12, %v993_v13 }
 0xeec   : > { %997 = vrot.lane.b32.xlu0 %v995_v18, %s1706_s30 }
 0xf5e   : > { %v998_v17 = vpop.permute.xlu0 %997 }
 0xf5f   : > { %v1000_v15 = vadd.f32 %v998_v17, %v990_v14 }
 0xf61   : > { %1637 = vtanh.f32 %v1000_v15 }
 0xf6e   : > { %v1638_v16 = vpop.eup %1637 }
 0xf6f   : > { %1003 = vrot.lane.b32.xlu1 %v1638_v16, %s1705_s23 }
 0xfe1   : > { %v1004_v21 = vpop.permute.xlu1 %1003 }
 0xfe2   : > { %v1006_v22 = vmul.f32 %v1636_v12, %v1004_v21 }
 0xfe4   : > { %1008 = vrot.lane.b32.xlu0 %v1006_v22, %s1706_s30 }
0x1056   : > { %v1009_v23 = vpop.permute.xlu0 %1008 }
0x1057   : > { %1012 = vst.msk [vmem:[#allocation5 + $0x2] sm:$0x3] %vm906_vm8, %v1009_v23  ;;  %1541 = vmatmul.mubr.msk.f32.vlgmr.msra.gmra.mxu0 %vm799_vm7, %v1009_v23 }
0x1117   : > { %v1083_v25 = vpop.f32.mrf.mxu0 }
0x1118   : > { %v1087_v26 = vadd.f32 %v1083_v25, %v1014_v24 }
0x1119   : > { %v1542_v27 = vpop.f32.mrf.mxu0 }
0x111a   : > { %1639 = vtanh.f32 %v1087_v26  ;;  %v1425_v29 = vmul.f32 -1.442695, %v1087_v26 }
0x111c   : > { %1641 = vpow2.f32 %v1425_v29 }
0x1127   : > { %v1640_v28 = vpop.eup %1639 }
0x1128   : > { %1097 = vrot.lane.b32.xlu1 %v1640_v28, %s1705_s23 }
0x1129   : > { %v1642_v30 = vpop.eup %1641 }
0x112a   : > { %v1091_v31 = vadd.f32 1.0, %v1642_v30 }
0x112c   : > { %1643 = vrcp.f32 %v1091_v31 }
0x1139   : > { %v1644_v32 = vpop.eup %1643 }
0x113a   : > { %v1095_v35 = vmul.f32 %v1644_v32, %v1000_v15 }
0x119a   : > { %v1098_v33 = vpop.permute.xlu1 %1097 }
0x119b   : > { %v1100_v34 = vmul.f32 %v1644_v32, %v1098_v33 }
0x119d   : > { %1102 = vrot.lane.b32.xlu0 %v1100_v34, %s1706_s30 }
0x120f   : > { %v1103_v36 = vpop.permute.xlu0 %1102 }
0x1210   : > { %v1105_v37 = vadd.f32 %v1103_v36, %v1095_v35 }
0x1212   : > { %1645 = vtanh.f32 %v1105_v37 }
0x121f   : > { %v1646_v38 = vpop.eup %1645 }
0x1220   : > { %1108 = vrot.lane.b32.xlu1 %v1646_v38, %s1705_s23 }
0x1292   : > { %v1109_v39 = vpop.permute.xlu1 %1108 }
0x1293   : > { %v1111_v40 = vmul.f32 %v1644_v32, %v1109_v39 }
0x1295   : > { %1113 = vrot.lane.b32.xlu0 %v1111_v40, %s1706_s30 }
0x1307   : > { %v1114_v41 = vpop.permute.xlu0 %1113 }
0x1308   : > { %1117 = vst.msk [vmem:[#allocation5 + $0x4] sm:$0x3] %vm906_vm8, %v1114_v41  ;;  %1552 = vmatmul.mubr.msk.f32.vlgmr.msra.gmra.mxu1 %vm799_vm7, %v1114_v41 }
0x13c8   : > { %v1188_v43 = vpop.f32.mrf.mxu1 }
0x13c9   : > { %v1192_v44 = vadd.f32 %v1188_v43, %v1119_v42 }
0x13ca   : > { %v1553_v45 = vpop.f32.mrf.mxu1 }
0x13cb   : > { %1647 = vtanh.f32 %v1192_v44  ;;  %v1427_v47 = vmul.f32 -1.442695, %v1192_v44 }
0x13cd   : > { %1649 = vpow2.f32 %v1427_v47 }
0x13d8   : > { %v1648_v46 = vpop.eup %1647 }
0x13d9   : > { %1202 = vrot.lane.b32.xlu1 %v1648_v46, %s1705_s23 }
0x13da   : > { %v1650_v48 = vpop.eup %1649 }
0x13db   : > { %v1196_v49 = vadd.f32 1.0, %v1650_v48 }
0x13dd   : > { %1651 = vrcp.f32 %v1196_v49 }
0x13ea   : > { %v1652_v50 = vpop.eup %1651 }
0x13eb   : > { %v1200_v53 = vmul.f32 %v1652_v50, %v1105_v37 }
0x144b   : > { %v1203_v51 = vpop.permute.xlu1 %1202 }
0x144c   : > { %v1205_v52 = vmul.f32 %v1652_v50, %v1203_v51 }
0x144e   : > { %1207 = vrot.lane.b32.xlu0 %v1205_v52, %s1706_s30 }
0x14c0   : > { %v1208_v54 = vpop.permute.xlu0 %1207 }
0x14c1   : > { %v1210_v55 = vadd.f32 %v1208_v54, %v1200_v53 }
0x14c3   : > { %1653 = vtanh.f32 %v1210_v55 }
0x14d0   : > { %v1654_v56 = vpop.eup %1653 }
0x14d1   : > { %1213 = vrot.lane.b32.xlu1 %v1654_v56, %s1705_s23 }
0x14d5   : > { %1225 = vrot.lane.b32.xlu1 %v1210_v55, %s1707_s7 }
0x1543   : > { %v1214_v57 = vpop.permute.xlu1 %1213 }
0x1544   : > { %v1216_v58 = vmul.f32 %v1652_v50, %v1214_v57 }
0x1546   : > { %1218 = vrot.lane.b32.xlu0 %v1216_v58, %s1706_s30 }
0x1547   : > { %v1226_v59 = vpop.permute.xlu1 %1225 }
0x1548   : > { %1228 = vst.msk [vmem:[#allocation4] sm:$0x3] %vm906_vm8, %v1226_v59 }
0x15b8   : > { %v1219_v60 = vpop.permute.xlu0 %1218 }
0x15b9   : > { %1222 = vst.msk [vmem:[#allocation5 + $0x6] sm:$0x3] %vm906_vm8, %v1219_v60  ;;  %1223 = vst.msk [vmem:[#allocation3] sm:$0x3] %vm906_vm8, %v1219_v60 }
0x15ba PF: > { %v1428_v61 = vld [vmem:[%s1935_s4] ss:$0 sm:$0xff]  ;;  %v1231_v62 = vld [vmem:[#allocation5] sm:$0x3]  ;;  %vm1245_vm9 = vcmask 254976   ;;  %s1230_s11 = sld [smem:[#allocation6]] }
0x15bb   : > { %v1241_v63 = vmul.f32 %v1428_v61, %v1231_v62  ;;  %v1233_v0 = vld [vmem:[#allocation5 + $0x4] sm:$0x3]  ;;  %v1232_v1 = vld [vmem:[#allocation5 + $0x2] sm:$0x3]  ;;  %v1292_v33 = vand.u32 127, %v306_v2  ;;  %vm1309_vm10 = vcmask 1041409  }
0x15bc   : > { %v1243_v4 = vmul.f32 %v1428_v61, %v1233_v0  ;;  %v1242_v5 = vmul.f32 %v1428_v61, %v1232_v1  ;;  %vm1311_vm11 = vcmask 1042434   ;;  %vm1313_vm12 = vcmask 1043459  }
0x15bd   : > { %v1246_v8 = vsel %vm1245_vm9, %v1241_v63, 0.0  ;;  %v1295_v34 = vsub.s32 %v1292_v33, %v1778_v6  ;;  %vm1316_vm13 = vcmask 11264  }
0x15be   : > { %1247 = vadd.xlane.f32.xlu0 %v1246_v8  ;;  %v1252_v9 = vsel %vm1245_vm9, %v1243_v4, 0.0  ;;  %v1249_v20 = vsel %vm1245_vm9, %v1242_v5, 0.0 }
0x15bf   : > { %1253 = vadd.xlane.f32.xlu1 %v1252_v9 }
0x15c0   : > { %v1234_v3 = vld [vmem:[#allocation5 + $0x6] sm:$0x3]  ;;  %v1258_v11 = vstv %s1230_s11 }
0x15c1   : > { %v1244_v7 = vmul.f32 %v1428_v61, %v1234_v3 }
0x15c2   : > { %1250 = vadd.xlane.f32.xlu0 %v1249_v20 }
0x15c3   : > { %v1255_v10 = vsel %vm1245_vm9, %v1244_v7, 0.0 }
0x15c4   : > { %1256 = vadd.xlane.f32.xlu1 %v1255_v10 }
0x1647   : > { %v1248_v19 = vpop.xlane.xlu0 %1247 }
0x1648   : > { %v1259_v12 = vadd.f32 %v1258_v11, %v1248_v19  ;;  %v1254_v13 = vpop.xlane.xlu1 %1253 }
0x1649   : > { %v1261_v18 = vadd.f32 %v1258_v11, %v1254_v13 }
0x164a   : > { %v1429_v14 = vmul.f32 -1.442695, %v1259_v12 }
0x164b   : > { %v1431_v17 = vmul.f32 -1.442695, %v1261_v18  ;;  %v1251_v15 = vpop.xlane.xlu0 %1250 }
0x164c   : > { %1655 = vpow2.f32 %v1429_v14  ;;  %v1260_v16 = vadd.f32 %v1258_v11, %v1251_v15 }
0x164d   : > { %v1257_v21 = vpop.xlane.xlu1 %1256  ;;  %1657 = vpow2.f32 %v1431_v17 }
0x164e   : > { %v1262_v22 = vadd.f32 %v1258_v11, %v1257_v21  ;;  %v1430_v23 = vmul.f32 -1.442695, %v1260_v16 }
0x1650   : > { %v1432_v24 = vmul.f32 -1.442695, %v1262_v22  ;;  %1659 = vpow2.f32 %v1430_v23 }
0x1652   : > { %1661 = vpow2.f32 %v1432_v24 }
0x1659   : > { %v1656_v25 = vpop.eup %1655 }
0x165a   : > { %v1658_v26 = vpop.eup %1657  ;;  %v1275_v27 = vadd.f32 1.0, %v1656_v25 }
0x165b   : > { %v1277_v28 = vadd.f32 1.0, %v1658_v26 }
0x165c   : > { %1663 = vrcp.f32 %v1275_v27 }
0x165d   : > { %v1660_v29 = vpop.eup %1659  ;;  %1665 = vrcp.f32 %v1277_v28 }
0x165e   : > { %v1276_v31 = vadd.f32 1.0, %v1660_v29 }
0x165f   : > { %v1662_v30 = vpop.eup %1661 }
0x1660   : > { %v1278_v32 = vadd.f32 1.0, %v1662_v30  ;;  %1667 = vrcp.f32 %v1276_v31 }
0x1662   : > { %1669 = vrcp.f32 %v1278_v32 }
0x1669   : > { %v1664_v35 = vpop.eup %1663 }
0x166a   : > { %v1666_v36 = vpop.eup %1665  ;;  %v1296_v39 = vrot.slane %v1664_v35, %v1295_v34 }
0x166b   : > { %v1304_v41 = vrot.slane %v1666_v36, %v1295_v34 }
0x166d   : > { %v1668_v37 = vpop.eup %1667 }
0x166e   : > { %v1300_v40 = vrot.slane %v1668_v37, %v1295_v34 }
0x166f   : > { %v1670_v38 = vpop.eup %1669 }
0x1670   : > { %v1308_v42 = vrot.slane %v1670_v38, %v1295_v34  ;;  %v1310_v43 = vsel %vm1309_vm10, %v1300_v40, %v1296_v39 }
0x1671   : > { %v1312_v44 = vsel %vm1311_vm11, %v1304_v41, %v1310_v43 }
0x1672   : > { %v1314_v45 = vsel %vm1313_vm12, %v1308_v42, %v1312_v44 }
0x1673   : > { %1317 = vst.msk [vmem:[%s1775_s9] sm:$0xf] %vm1316_vm13, %v1314_v45 }
0x1674 PF: > { %s17_s25 = sadd.s32 1, %s1693_s25   ;;  %s1938_s23 = smov %s1689_s24 }
0x1675   : > { %p14_p8 = scmp.ge.s32.totalorder %s17_s25, 4   ;;  %s1939_s24 = smov %s1941_s5 }
0x1677   :  { %16 = sbr.rel (!%p14_p8) target bundleno = 2 (0x2), region = 94 }

</bundles_post_ra>
